<compile_context>
chip_gen: v6e
topology: v6e:2x2x1
jax: 0.10.0
libtpu: 0.0.40
codegen_flags: <defaults>
</compile_context>

<pallas_src>
import jax
import jax.numpy as jnp
from jax.experimental import pallas as pl
from jax.experimental.pallas import tpu as pltpu


def _gcn_kernel(x_ref, adj_ref, w_ref, b_ref, o_ref, h1_ref, h2_ref):
    # x_ref  : (Bt, N, Din)   activations, resident across node tiles
    # adj_ref: (Bt, TN, N)    adjacency row tile
    # w_ref  : (Din, 2*Dout)  concat(W1^T, W2^T)  -- resident
    # b_ref  : (1, Dout)      b1 + b2             -- resident
    # o_ref  : (Bt, TN, Dout) output row tile
    # h1_ref : VMEM (Bt, N, Dout) f32 scratch  = x @ W1^T
    # h2_ref : VMEM (Bt, N, Dout) f32 scratch  = x @ W2^T
    n_idx = pl.program_id(1)
    Bt, N, Din = x_ref.shape
    TN = o_ref.shape[1]
    Dout = o_ref.shape[2]

    # One fused weight matmul per batch tile (first node tile only).
    @pl.when(n_idx == 0)
    def _():
        x2d = x_ref[...].reshape(Bt * N, Din)
        h = jnp.dot(x2d, w_ref[...], preferred_element_type=jnp.float32)  # (Bt*N, 2*Dout)
        h1_ref[...] = h[:, :Dout].reshape(Bt, N, Dout)
        h2_ref[...] = h[:, Dout:].reshape(Bt, N, Dout)

    row0 = pl.multiple_of(n_idx * TN, TN)
    h1_tile = h1_ref[:, pl.ds(row0, TN), :]                 # (Bt, TN, Dout)

    # forward_input = fc2(adj @ x) = adj @ (x @ W2^T)  (+ bias folded into b_ref)
    agg = jnp.einsum("bnm,bmd->bnd", adj_ref[...], h2_ref[...],
                     preferred_element_type=jnp.float32)    # (Bt, TN, Dout)

    o_ref[...] = (h1_tile + agg + b_ref[...]).astype(o_ref.dtype)


def _working_set_bytes(bt, tn, N, Din, Dout, itemsize=4):
    # Double-buffered input/output tiles + resident weights + f32 scratch.
    dbl = 2 * itemsize * (bt * N * Din + bt * tn * N + bt * tn * Dout)
    scratch = 4 * (2 * bt * N * Dout)
    weights = 2 * itemsize * (Din * 2 * Dout + Dout)
    return dbl + scratch + weights


def _pick_tiles(B, N, Din, Dout, budget_bytes):
    # Node tile: prefer the whole node dim; shrink (multiples of 8 dividing N)
    # only if the f32 adjacency tile would blow the VMEM budget even at Bt=1.
    tn = N
    if _working_set_bytes(1, N, N, Din, Dout) > budget_bytes:
        cands = [t for t in range(8, N, 8) if N % t == 0]
        for t in sorted(cands, reverse=True):
            if _working_set_bytes(1, t, N, Din, Dout) <= budget_bytes:
                tn = t
                break
        else:
            tn = cands[0] if cands else N

    # Batch tile: largest divisor of B that fits the budget while keeping at
    # least two batch grid steps when B >= 2 (v7x has 2 TensorCores).
    bt = 1
    for cand in range(1, B + 1):
        if B % cand:
            continue
        if B >= 2 and (B // cand) < 2:
            continue
        if _working_set_bytes(cand, tn, N, Din, Dout) <= budget_bytes:
            bt = cand
    return bt, tn


def graph_convolution(x, adj, w1, b1, w2, b2):
    """x: [B, N, Din], adj: [B, N, N], w1/w2: [Dout, Din] (torch layout),
    b1/b2: [Dout]. Returns [B, N, Dout]."""
    B, N, Din = x.shape
    Dout = w1.shape[0]

    # Fuse the two Linear layers: one (Din, 2*Dout) weight, one pre-summed bias.
    # (If weights are static, precompute these once outside the call.)
    w_cat = jnp.concatenate([jnp.asarray(w1).T, jnp.asarray(w2).T], axis=1)  # (Din, 2*Dout)
    b_sum = (jnp.asarray(b1) + jnp.asarray(b2)).reshape(1, Dout)

    # Budget tiles conservatively so the same tiling fits v5e/v6e (128 MiB) and
    # v7x (64 MiB physical); raise the scoped VMEM limit above the 16/32 MiB default.
    budget_bytes = 40 * 1024 * 1024
    bt, tn = _pick_tiles(B, N, Din, Dout, budget_bytes)
    grid = (B // bt, pl.cdiv(N, tn))

    return pl.pallas_call(
        _gcn_kernel,
        out_shape=jax.ShapeDtypeStruct((B, N, Dout), x.dtype),
        grid_spec=pltpu.PrefetchScalarGridSpec(
            num_scalar_prefetch=0,
            grid=grid,
            in_specs=[
                # Activations: full node dim, resident while the node tile advances.
                pl.BlockSpec((bt, N, Din), lambda b, n: (b, 0, 0)),
                # Adjacency: row tile per node step.
                pl.BlockSpec((bt, tn, N), lambda b, n: (b, n, 0)),
                # Fused weights / bias: constant index map -> fetched once, resident.
                pl.BlockSpec((Din, 2 * Dout), lambda b, n: (0, 0)),
                pl.BlockSpec((1, Dout), lambda b, n: (0, 0)),
            ],
            out_specs=pl.BlockSpec((bt, tn, Dout), lambda b, n: (b, n, 0)),
            scratch_shapes=[
                pltpu.VMEM((bt, N, Dout), jnp.float32),  # h1 = x @ W1^T
                pltpu.VMEM((bt, N, Dout), jnp.float32),  # h2 = x @ W2^T
            ],
        ),
        compiler_params=pltpu.CompilerParams(
            dimension_semantics=("parallel", "arbitrary"),
            vmem_limit_bytes=64 * 1024 * 1024,
        ),
    )(x, adj, w_cat, b_sum)


def _reference(x, adj, w1, b1, w2, b2):
    # Plain-JAX reference matching torch semantics (unfused).
    state_in = jnp.einsum("bnd,od->bno", x, w1) + b1
    agg = jnp.einsum("bnm,bmd->bnd", adj, x)
    fwd = jnp.einsum("bnd,od->bno", agg, w2) + b2
    return state_in + fwd


if __name__ == "__main__":
    # Small shapes consistent with the module: batch=2, nodes=16,
    # state_dim=32, out_state_dim=32.
    B, N, Din, Dout = 2, 16, 32, 32

    key = jax.random.PRNGKey(0)
    k_x, k_adj, k_w1, k_b1, k_w2, k_b2 = jax.random.split(key, 6)

    x = jax.random.normal(k_x, (B, N, Din), dtype=jnp.float32)
    adj = jax.random.uniform(k_adj, (B, N, N), dtype=jnp.float32)

    # Deterministic Linear-style init (torch layout: weight [out, in], bias [out]).
    bound1 = 1.0 / (Din ** 0.5)
    w1 = jax.random.uniform(k_w1, (Dout, Din), minval=-bound1, maxval=bound1, dtype=jnp.float32)
    b1 = jax.random.uniform(k_b1, (Dout,), minval=-bound1, maxval=bound1, dtype=jnp.float32)
    w2 = jax.random.uniform(k_w2, (Dout, Din), minval=-bound1, maxval=bound1, dtype=jnp.float32)
    b2 = jax.random.uniform(k_b2, (Dout,), minval=-bound1, maxval=bound1, dtype=jnp.float32)

    out = graph_convolution(x, adj, w1, b1, w2, b2)
    out = jax.block_until_ready(out)

    ref = _reference(x, adj, w1, b1, w2, b2)
    assert out.shape == (B, N, Dout)
    assert jnp.allclose(out, ref, atol=1e-4, rtol=1e-4), "mismatch vs reference"

    print("KERNEL_OK")
</pallas_src>

<mosaic_0001>
module attributes {stable_mosaic.version = 11 : i64} {
  func.func @_gcn_kernel(%arg0: i32, %arg1: i32, %arg2: memref<1x16x32xf32, #tpu.memory_space<vmem>>, %arg3: memref<1x16x16xf32, #tpu.memory_space<vmem>>, %arg4: memref<32x64xf32, #tpu.memory_space<vmem>>, %arg5: memref<1x32xf32, #tpu.memory_space<vmem>>, %arg6: memref<1x16x32xf32, #tpu.memory_space<vmem>>, %arg7: memref<1x16x32xf32, #tpu.memory_space<vmem>>, %arg8: memref<1x16x32xf32, #tpu.memory_space<vmem>>) attributes {dimension_semantics = [#tpu.dimension_semantics<parallel>, #tpu.dimension_semantics<arbitrary>], iteration_bounds = array<i64: 2, 1>, scalar_prefetch = 0 : i64, scratch_operands = 2 : i64, tpu.core_type = #tpu.core_type<tc>, window_params = [{transform_indices = @transform_0, window_bounds = array<i64: 1, 16, 32>}, {transform_indices = @transform_1, window_bounds = array<i64: 1, 16, 16>}, {pipeline_mode = #tpu.pipeline_mode<synchronous>, transform_indices = @transform_2, window_bounds = array<i64: 32, 64>}, {pipeline_mode = #tpu.pipeline_mode<synchronous>, transform_indices = @transform_3, window_bounds = array<i64: 1, 32>}, {transform_indices = @transform_4, window_bounds = array<i64: 1, 16, 32>}]} {
    %c0_i32 = arith.constant 0 : i32
    %0 = arith.cmpi eq, %arg1, %c0_i32 : i32
    %1 = arith.extui %0 : i1 to i32
    %c0_i32_0 = arith.constant 0 : i32
    %2 = arith.cmpi ne, %1, %c0_i32_0 : i32
    scf.if %2 {
      %c0_13 = arith.constant 0 : index
      %c0_14 = arith.constant 0 : index
      %c0_15 = arith.constant 0 : index
      %16 = vector.load %arg2[%c0_13, %c0_14, %c0_15] : memref<1x16x32xf32, #tpu.memory_space<vmem>>, vector<1x16x32xf32>
      %17 = vector.shape_cast %16 : vector<1x16x32xf32> to vector<16x32xf32>
      %c0_16 = arith.constant 0 : index
      %c0_17 = arith.constant 0 : index
      %18 = vector.load %arg4[%c0_16, %c0_17] : memref<32x64xf32, #tpu.memory_space<vmem>>, vector<32x64xf32>
      %cst_18 = arith.constant dense<0.000000e+00> : vector<16x64xf32>
      %19 = tpu.matmul %17, %18, %cst_18 {dimension_numbers = #tpu.dot_dimension_numbers<[1], [0], [0], [1], [0, 0, 1, 1], [], []>} : vector<16x32xf32>, vector<32x64xf32>, vector<16x64xf32> -> vector<16x64xf32>
      %20 = vector.extract_strided_slice %19 {offsets = [0, 0], sizes = [16, 32], strides = [1, 1]} : vector<16x64xf32> to vector<16x32xf32>
      %21 = vector.shape_cast %20 : vector<16x32xf32> to vector<1x16x32xf32>
      %c0_19 = arith.constant 0 : index
      %c0_20 = arith.constant 0 : index
      %c0_21 = arith.constant 0 : index
      %22 = vector.load %arg7[%c0_19, %c0_20, %c0_21] : memref<1x16x32xf32, #tpu.memory_space<vmem>>, vector<1x16x32xf32>
      tpu.vector_store %arg7[%c0_19, %c0_20, %c0_21], %21 {strides = array<i32>} : memref<1x16x32xf32, #tpu.memory_space<vmem>>, vector<1x16x32xf32>,
      %23 = vector.extract_strided_slice %19 {offsets = [0, 32], sizes = [16, 32], strides = [1, 1]} : vector<16x64xf32> to vector<16x32xf32>
      %24 = vector.shape_cast %23 : vector<16x32xf32> to vector<1x16x32xf32>
      %c0_22 = arith.constant 0 : index
      %c0_23 = arith.constant 0 : index
      %c0_24 = arith.constant 0 : index
      %25 = vector.load %arg8[%c0_22, %c0_23, %c0_24] : memref<1x16x32xf32, #tpu.memory_space<vmem>>, vector<1x16x32xf32>
      tpu.vector_store %arg8[%c0_22, %c0_23, %c0_24], %24 {strides = array<i32>} : memref<1x16x32xf32, #tpu.memory_space<vmem>>, vector<1x16x32xf32>,
    } else {
    }
    %c16_i32 = arith.constant 16 : i32
    %3 = arith.muli %arg1, %c16_i32 : i32
    %4 = tpu.assume_multiple %3, 16 : i32
    %c0 = arith.constant 0 : index
    %5 = arith.index_cast %4 : i32 to index
    %c0_1 = arith.constant 0 : index
    %6 = vector.load %arg7[%c0, %5, %c0_1] : memref<1x16x32xf32, #tpu.memory_space<vmem>>, vector<1x16x32xf32>
    %c0_2 = arith.constant 0 : index
    %c0_3 = arith.constant 0 : index
    %c0_4 = arith.constant 0 : index
    %7 = vector.load %arg3[%c0_2, %c0_3, %c0_4] : memref<1x16x16xf32, #tpu.memory_space<vmem>>, vector<1x16x16xf32>
    %c0_5 = arith.constant 0 : index
    %c0_6 = arith.constant 0 : index
    %c0_7 = arith.constant 0 : index
    %8 = vector.load %arg8[%c0_5, %c0_6, %c0_7] : memref<1x16x32xf32, #tpu.memory_space<vmem>>, vector<1x16x32xf32>
    "tpu.trace_start"() <{level = 10 : i32, message = "bnm,bmd->bnd"}> : () -> ()
    %cst = arith.constant dense<0.000000e+00> : vector<1x16x32xf32>
    %9 = tpu.matmul %7, %8, %cst {dimension_numbers = #tpu.dot_dimension_numbers<[2], [1], [1], [2], [0, 0, 0, 1, 1, 2], [0], [0]>} : vector<1x16x16xf32>, vector<1x16x32xf32>, vector<1x16x32xf32> -> vector<1x16x32xf32>
    "tpu.trace_stop"() : () -> ()
    %10 = arith.addf %6, %9 : vector<1x16x32xf32>
    %c0_8 = arith.constant 0 : index
    %c0_9 = arith.constant 0 : index
    %11 = vector.load %arg5[%c0_8, %c0_9] : memref<1x32xf32, #tpu.memory_space<vmem>>, vector<1x32xf32>
    %12 = vector.shape_cast %11 : vector<1x32xf32> to vector<1x1x32xf32>
    %13 = vector.broadcast %12 : vector<1x1x32xf32> to vector<1x16x32xf32>
    %14 = arith.addf %10, %13 : vector<1x16x32xf32>
    %c0_10 = arith.constant 0 : index
    %c0_11 = arith.constant 0 : index
    %c0_12 = arith.constant 0 : index
    %15 = vector.load %arg6[%c0_10, %c0_11, %c0_12] : memref<1x16x32xf32, #tpu.memory_space<vmem>>, vector<1x16x32xf32>
    tpu.vector_store %arg6[%c0_10, %c0_11, %c0_12], %14 {strides = array<i32>} : memref<1x16x32xf32, #tpu.memory_space<vmem>>, vector<1x16x32xf32>,
    return
  }
  func.func @transform_0(%arg0: i32, %arg1: i32) -> (i32, i32, i32) {
    %c0_i32 = arith.constant 0 : i32
    %c0_i32_0 = arith.constant 0 : i32
    %c0_i32_1 = arith.constant 0 : i32
    return %arg0, %c0_i32, %c0_i32_0 : i32, i32, i32
  }
  func.func @transform_1(%arg0: i32, %arg1: i32) -> (i32, i32, i32) {
    %c0_i32 = arith.constant 0 : i32
    %c0_i32_0 = arith.constant 0 : i32
    return %arg0, %arg1, %c0_i32 : i32, i32, i32
  }
  func.func @transform_2(%arg0: i32, %arg1: i32) -> (i32, i32) {
    %c0_i32 = arith.constant 0 : i32
    %c0_i32_0 = arith.constant 0 : i32
    %c0_i32_1 = arith.constant 0 : i32
    return %c0_i32, %c0_i32_0 : i32, i32
  }
  func.func @transform_3(%arg0: i32, %arg1: i32) -> (i32, i32) {
    %c0_i32 = arith.constant 0 : i32
    %c0_i32_0 = arith.constant 0 : i32
    %c0_i32_1 = arith.constant 0 : i32
    return %c0_i32, %c0_i32_0 : i32, i32
  }
  func.func @transform_4(%arg0: i32, %arg1: i32) -> (i32, i32, i32) {
    %c0_i32 = arith.constant 0 : i32
    %c0_i32_0 = arith.constant 0 : i32
    return %arg0, %arg1, %c0_i32 : i32, i32, i32
  }
}

</mosaic_0001>

<bundles_post_ra>
// kernel: tpu_custom_call.1
= control target key start
LH: loop header
LB: loop body
LE: loop exit
PB: predicated region body
PF: predicated region fallthrough
CT: control target
= control target key end

     0   :  { %s1209_s0 = inlined_call_operand.hbm [shape: f32[2,16,32], index: 0, kind: input, shape index: {}]   ;;  %s1210_s1 = inlined_call_operand.hbm [shape: f32[2,16,16], index: 1, kind: input, shape index: {}]   ;;  %s1211_s2 = inlined_call_operand.hbm [shape: f32[32,64], index: 2, kind: input, shape index: {}]   ;;  %s1212_s3 = inlined_call_operand.vmem [shape: f32[1,32], index: 3, kind: input, shape index: {}]   ;;  %s1213_s4 = inlined_call_operand.hbm [shape: f32[2,16,32], index: 4, kind: output, shape index: {}]  }
   0x1   :  { %1220 = sst [smem:[#allocation17_spill]] %s1211_s2 }
   0x2   :  { %9 = vsyncpa [#allocation5], 0 }
   0x3   :  { %11 = vsyncpa [#allocation5 + $0x1], 0 }
   0x4   :  { %12 = vsyncpa [#allocation8], 0 }
   0x5   :  { %14 = vsyncpa [#allocation8 + $0x1], 0 }
   0x6   :  { %15 = vsyncpa [#allocation6], 0 }
   0x7   :  { %17 = vsyncpa [#allocation6 + $0x1], 0  ;;  %s981_s15 = smov 0   ;;  %s983_s16 = smov 0  }
   0x8   :  { %s985_s17 = smov 0   ;;  %s987_s18 = smov 0  }
   0x9   :  { %s989_s19 = smov 0   ;;  %s991_s20 = smov 0  }
   0xa LB: > { %1221 = sst [smem:[#allocation15_spill]] %s941_s19  ;;  %s1012_s21 = sadd.s32 4294967295, %s945_s20   ;;  %s945_s20 = sphi %s991_s20, %s23_s20   ;;  %s941_s19 = sphi %s989_s19, %s1237_s19   ;;  %s937_s18 = sphi %s987_s18, %s1236_s18   ;;  %s933_s17 = sphi %s985_s17, %s1240_s17   ;;  %s929_s16 = sphi %s983_s16, %s1239_s16   ;;  %s925_s15 = sphi %s981_s15, %s1238_s15  }
   0xb   : > { %s636_s22 = sadd.s32 4294967294, %s945_s20   ;;  %p55_p0 = scmp.ne.s32.totalorder %s929_s16, %s925_s15 }
   0xc   : > { %p56_p1 = scmp.eq.s32.totalorder %s1012_s21, 0  ;;  %p157_p3 = scmp.eq.s32.totalorder %s636_s22, 1 }
   0xd   : > { %p637_p5 = scmp.ge.s32.totalorder %s945_s20, 1  ;;  %p164_p7 = scmp.lt.s32.totalorder %s945_s20, 3 }
   0xe   : > { %p1021_p4 = por %p56_p1, %p55_p0  ;;  %p1026_p6 = por %p157_p3, %p55_p0 }
   0xf   : > { %p1031_p8 = pnand %p637_p5, %p164_p7  ;;  %s947_s26 = smov [#allocation9]  }
  0x10   : > { %s1223_s24 = scalar_select %p1026_p6, 1, 0 }
  0x11   : > { %s176_s27 = sshll.u32 %s947_s26, 4  ;;  %p702_p9 = pneg %p1031_p8  ;;  %s177_s27 = int_to_ptr.vmem [resolvable:$true] %s176_s27 }
  0x12   : > { %s35_s29 = sadd.s32 1, %s941_s19  ;;  %s786_s30 = scalar_lea.vmem %s177_s27, 512 }
  0x13   : > { %p1040_p11 = pnand %p702_p9, %p56_p1  ;;  %p787_p13 = scmp.ne.s32.totalorder %s177_s27, %s786_s30 }
  0x14   : > { %p794_p5 = scmp.lt.s32.totalorder %s177_s27, %s177_s27  ;;  %p795_p7 = scmp.lt.s32.totalorder %s786_s30, %s786_s30 }
  0x15   : > { %p777_p12 = pneg %p1040_p11 }
  0x16   : > { %p796_p2 = por %p795_p7, %p794_p5 }
  0x17   : > { %p789_p0 = pnand %p787_p13, %p777_p12 }
  0x19   : > { %p790_p3 = pneg %p789_p0 }
  0x1b   : > { %p797_p6 = pnand %p796_p2, %p790_p3 }
  0x1d   : > { %800 = shalt.err (!%p797_p6)
}
  0x1e   : > { %s1214_s5 = smov 128   ;;  %s1216_s6 = smov 8  }
  0x1f   : > { %s1226_s2 = sld [smem:[#allocation17_spill]]  ;;  %p37_p2 = scmp.ge.s32.totalorder %s35_s29, 2 }
  0x20   : > { %s42_s9 = sadd.s32 1, %s933_s17  ;;  %p49_p6 = scmp.ne.s32.totalorder %s933_s17, %s929_s16 }
  0x21   : > { %p50_p9 = scmp.eq.s32.totalorder %s945_s20, 0  ;;  %s1242_s29 = smov (%p37_p2, %s35_s29), 0 }
  0x22   : > { %1227 = sst [smem:[#allocation16_spill]] %s1242_s29  ;;  %p1229_p13 = scmp.eq.s32.totalorder %s1012_s21, 1 }
  0x23   : > { %p1061_p12 = por %p50_p9, %p49_p6  ;;  %s39_s12 = ssub.s32 %s941_s19, %s1242_s29 }
  0x24   : > { %p1067_p0 = por %p1229_p13, %p49_p6  ;;  %p718_p3 = scmp.lt.s32.totalorder %s945_s20, 2 }
  0x25   : > { %705 = dma.hbm_to_vmem [thread:$0]  (!%p1040_p11), %s1226_s2, 512, %s177_s27, [#allocation8], %s1214_s5, %s1214_s5, %s1216_s6  }
  0x26   : > { %p40_p11 = scmp.eq.s32.totalorder %s39_s12, 0  ;;  %s193_s13 = sand.u32 1, %s933_s17  }
  0x27   : > { %s640_s14 = sshll.u32 %s193_s13, 4  ;;  %s661_s26 = sshll.u32 %s941_s19, 8 }
  0x28   : > { %s1076_s22 = scalar_select %p40_p11, %s933_s17, %s42_s9  }
  0x29   : > { %s203_s30 = scalar_lea.hbm %s1209_s0, %s661_s26  ;;  %s197_s7 = scalar_lea.vmem [#allocation4], %s640_s14 }
  0x2a   : > { %s204_s8 = sshll.u32 %s197_s7, 4  ;;  %p1084_p5 = pnand %p718_p3, %p1061_p12  ;;  %s205_s8 = int_to_ptr.vmem [resolvable:$true] %s204_s8 }
  0x2b   : > { %s1091_s9 = scalar_lea.hbm %s1210_s1, %s661_s26  ;;  %s218_s12 = scalar_lea.vmem [#allocation7], %s640_s14 }
  0x2c   : > { %s227_s29 = sshll.u32 %s218_s12, 4  ;;  %s194_s19 = scalar_lea.sflag [#allocation5], %s193_s13  ;;  %s228_s29 = int_to_ptr.vmem [resolvable:$true] %s227_s29 }
  0x2d   : > { %p803_p7 = pneg %p1084_p5  ;;  %s814_s27 = scalar_lea.vmem %s205_s8, 256 }
  0x2e   : > { %p815_p2 = scmp.ne.s32.totalorder %s205_s8, %s814_s27  ;;  %s950_s10 = smov [#allocation4]  }
  0x2f   : > { %s819_s28 = sshll.u32 %s950_s10, 4  ;;  %s820_s28 = int_to_ptr.vmem [resolvable:$false] %s819_s28 }
  0x30   : > { %p817_p6 = pnand %p815_p2, %p803_p7  ;;  %s821_s7 = scalar_lea.vmem %s820_s28, 512 }
  0x31   : > { %p822_p12 = scmp.lt.s32.totalorder %s205_s8, %s820_s28  ;;  %p823_p13 = scmp.lt.s32.totalorder %s821_s7, %s814_s27 }
  0x32   : > { %p818_p9 = pneg %p817_p6 }
  0x33   : > { %p824_p3 = por %p823_p13, %p822_p12 }
  0x35   : > { %p825_p11 = pnand %p824_p3, %p818_p9 }
  0x37   : > { %828 = shalt.err (!%p825_p11)
}
  0x38   : > { %s1232_s2 = smov 8   ;;  %s1233_s6 = smov 128  }
  0x39   : > { %709 = dma.hbm_to_vmem [thread:$0]  (!%p1084_p5), %s203_s30, 256, %s205_s8, %s194_s19, %s1233_s6, %s1233_s6, %s1232_s2  }
  0x3a   : > { %s214_s13 = sand.u32 1, %s945_s20   ;;  %s842_s26 = scalar_lea.vmem %s228_s29, 256 }
  0x3b   : > { %s215_s14 = scalar_lea.sflag [#allocation8], %s214_s13  ;;  %p843_p2 = scmp.ne.s32.totalorder %s228_s29, %s842_s26 }
  0x3c   : > { %s951_s12 = smov [#allocation7]  }
  0x3d   : > { %p845_p6 = pnand %p843_p2, %p803_p7  ;;  %s847_s27 = sshll.u32 %s951_s12, 4  ;;  %s848_s27 = int_to_ptr.vmem [resolvable:$false] %s847_s27 }
  0x3e   : > { %s849_s10 = scalar_lea.vmem %s848_s27, 512  ;;  %p850_p9 = scmp.lt.s32.totalorder %s228_s29, %s848_s27 }
  0x3f   : > { %p846_p10 = pneg %p845_p6  ;;  %p851_p12 = scmp.lt.s32.totalorder %s849_s10, %s842_s26 }
  0x41   : > { %p852_p13 = por %p851_p12, %p850_p9 }
  0x43   : > { %p853_p3 = pnand %p852_p13, %p846_p10 }
  0x45   : > { %856 = shalt.err (!%p853_p3)
}
  0x46   : > { %712 = dma.hbm_to_vmem [thread:$0]  (!%p1084_p5), %s1091_s9, 256, %s228_s29, %s215_s14, %s1233_s6, %s1233_s6, %s1232_s2  }
  0x47   : > { %239 = sbr.rel (%p1031_p8) target bundleno = 626 (0x272), region = 36  ;;  %s1116_s19 = sand.u32 (!%p1031_p8), 1, %s929_s16  }
  0x48   : > { %s1119_s30 = sshll.u32 (!%p1031_p8), %s1116_s19, 4  ;;  %s242_s8 = scalar_lea.sflag (!%p1031_p8), [#allocation5], %s1116_s19 }
  0x49   : > { %s245_s28 = scalar_lea.vmem (!%p1031_p8), [#allocation4], %s1119_s30 }
  0x4c   : > { %908 = dma.done.wait (%p1021_p4), %s242_s8, 256  }
  0x4d   : > { %910 = vsyncadd (%p1021_p4), %s242_s8, 4294967040  ;;  %s250_s25 = sand.u32 1, %s1012_s21   ;;  %s254_s5 = scalar_lea.vmem [#allocation7], %s1119_s30 }
  0x4e   : > { %s251_s29 = scalar_lea.sflag [#allocation8], %s250_s25 }
  0x4f   : > { %912 = dma.done.wait (%p1021_p4), %s251_s29, 256  }
  0x50   : > { %914 = vsyncadd (%p1021_p4), %s251_s29, 4294967040 }
  0x51   : > { %916 = dma.done.wait (%p56_p1), [#allocation8], 512  }
  0x52   : > { %918 = vsyncadd (%p56_p1), [#allocation8], 4294966784  ;;  %vm300_vm0 = vcmask 261120   ;;  %v299_v0 = vld [vmem:[#allocation9 + $0x18] sm:$0xff]  ;;  %v298_v1 = vld [vmem:[#allocation9 + $0x10] sm:$0xff]  ;;  %vm402_vm1 = vcmask 130048  }
  0x53   : > { %674 = vmatprep.subr.mxu0 %v299_v0  ;;  %v294_v2 = vld [vmem:[%s245_s28] sm:$0xff]  ;;  %v297_v3 = vld [vmem:[#allocation9 + $0x8] sm:$0xff]  ;;  %s952_s21 = smov 96   ;;  %s663_s7 = sshll.u32 %s937_s18, 8 }
  0x54   : > { %675 = vmatpush3.msra.mxu0 %v299_v0  ;;  %682 = vmatprep.mubr.msk.f32.mxu0 %vm300_vm0, %v294_v2  ;;  %v296_v4 = vld [vmem:[#allocation9] sm:$0xff]  ;;  %v295_v5 = vld [vmem:[%s245_s28 + $0x8] sm:$0xff]  ;;  %s287_s2 = scalar_lea.vmem [#allocation10], %s1119_s30  ;;  %s1157_s26 = scalar_lea.hbm %s1213_s4, %s663_s7 }
  0x55   : > { %676 = vmatprep.subr.mxu0 %v298_v1  ;;  %v398_v7 = vld [vmem:[%s254_s5] sm:$0xff]  ;;  %v399_v13 = vld [vmem:[%s254_s5 + $0x8] sm:$0xff]  ;;  %s514_s6 = sshll.u32 %s287_s2, 4  ;;  %s499_s18 = scalar_lea.sflag [#allocation6], %s1116_s19  ;;  %s1159_s6 = int_to_ptr.vmem [resolvable:$true] %s514_s6 }
  0x56   : > { %677 = vmatpush3.msra.mxu0 %v298_v1  ;;  %689 = vmatprep.mubr.msk.f32.mxu1 %vm402_vm1, %v398_v7  ;;  %v655_v16 = vld [vmem:[%s1212_s3] ss:$0 sm:$0xff]  ;;  %s857_s12 = scalar_lea.vmem %s1159_s6, 256  ;;  %s953_s27 = smov [#allocation10]  }
  0x57   : > { %678 = vmatprep.subr.mxu0 %v297_v3  ;;  %p858_p1 = scmp.ne.s32.totalorder %s1159_s6, %s857_s12  ;;  %s861_s10 = sshll.u32 %s953_s27, 4  ;;  %s862_s10 = int_to_ptr.vmem [resolvable:$false] %s861_s10 }
  0x58   : > { %679 = vmatpush3.msra.mxu0 %v297_v3  ;;  %s863_s30 = scalar_lea.vmem %s862_s10, 512  ;;  %p864_p10 = scmp.lt.s32.totalorder %s1159_s6, %s862_s10 }
  0x59   : > { %680 = vmatprep.subr.mxu0 %v296_v4  ;;  %p859_p4 = pnand %p858_p1, %p1067_p0  ;;  %p865_p5 = scmp.lt.s32.totalorder %s863_s30, %s857_s12 }
  0x5a   : > { %681 = vmatpush3.msra.mxu0 %v296_v4 }
  0x5b   : > { %683 = vmatmul.mubr.msk.f32.vlgmr.msra.gmra.mxu0 %vm300_vm0, %v295_v5  ;;  %p860_p8 = pneg %p859_p4  ;;  %p866_p7 = por %p865_p5, %p864_p10 }
  0x5d   : > { %p867_p11 = pnand %p866_p7, %p860_p8 }
 0x11b   : > { %v684_v6 = vpop.f32.mrf.mxu0 }
 0x11c   : > { %383 = vst.msk [vmem:[#allocation2 + $0x8] sm:$0xff] %vm300_vm0, %v684_v6  ;;  %388 = vrot.lane.b32.xlu0 %v684_v6, %s952_s21 }
 0x11d   : > { %v373_v8 = vpop.f32.mrf.mxu0 }
 0x11e   : > { %382 = vst.msk [vmem:[#allocation2] sm:$0xff] %vm300_vm0, %v373_v8 }
 0x120   : > { %386 = vrot.lane.b32.xlu0 %v373_v8, %s952_s21 }
 0x123   : > { %v397_v14 = vld [vmem:[#allocation2 + $0x8] sm:$0xff] }
 0x125   : > { %v396_v18 = vld [vmem:[#allocation2] sm:$0xff] }
 0x18e   : > { %v389_v9 = vpop.permute.xlu0 %388 }
 0x18f   : > { %393 = vst.msk [vmem:[#allocation3 + $0x8] sm:$0xff] %vm300_vm0, %v389_v9 }
 0x192   : > { %v387_v10 = vpop.permute.xlu0 %386 }
 0x193   : > { %392 = vst.msk [vmem:[#allocation3] sm:$0xff] %vm300_vm0, %v387_v10 }
 0x196   : > { %v401_v11 = vld [vmem:[#allocation3 + $0x8] sm:$0xff] }
 0x197   : > { %685 = vmatprep.subr.mxu1 %v401_v11 }
 0x198   : > { %686 = vmatpush3.msra.mxu1 %v401_v11 }
 0x19a   : > { %v400_v12 = vld [vmem:[#allocation3] sm:$0xff] }
 0x19b   : > { %687 = vmatprep.subr.mxu1 %v400_v12 }
 0x19c   : > { %688 = vmatpush3.msra.mxu1 %v400_v12 }
 0x19d   : > { %690 = vmatmul.mubr.msk.f32.vlgmr.msra.gmra.mxu1 %vm402_vm1, %v399_v13 }
 0x25d   : > { %v691_v15 = vpop.f32.mrf.mxu1 }
 0x25e   : > { %v485_v17 = vadd.f32 %v691_v15, %v397_v14 }
 0x25f   : > { %v475_v19 = vpop.f32.mrf.mxu1 }
 0x260   : > { %v494_v20 = vadd.f32 %v655_v16, %v485_v17  ;;  %v484_v21 = vadd.f32 %v475_v19, %v396_v18 }
 0x262   : > { %497 = vst.msk [vmem:[%s287_s2 + $0x8] sm:$0xff] %vm300_vm0, %v494_v20  ;;  %v493_v22 = vadd.f32 %v655_v16, %v484_v21 }
 0x264   : > { %496 = vst.msk [vmem:[%s287_s2] sm:$0xff] %vm300_vm0, %v493_v22 }
 0x265   : > { %870 = shalt.err (!%p867_p11)
}
 0x266   : > { %s871_s8 = scalar_lea.hbm %s1157_s26, 256  ;;  %s875_s29 = scalar_lea.hbm %s1213_s4, 512 }
 0x267   : > { %p872_p2 = scmp.ne.s32.totalorder %s1157_s26, %s871_s8  ;;  %p876_p12 = scmp.lt.s32.totalorder %s1157_s26, %s1213_s4 }
 0x268   : > { %p877_p13 = scmp.lt.s32.totalorder %s875_s29, %s871_s8 }
 0x269   : > { %p873_p6 = pnand %p872_p2, %p1067_p0 }
 0x26a   : > { %p878_p3 = por %p877_p13, %p876_p12 }
 0x26b   : > { %p874_p9 = pneg %p873_p6 }
 0x26d   : > { %p879_p1 = pnand %p878_p3, %p874_p9 }
 0x26f   : > { %882 = shalt.err (!%p879_p1)
}
 0x270   : > { %s954_s23 = smov 128   ;;  %s955_s9 = smov 8  }
 0x271   : > { %700 = dma.vmem_to_hbm [thread:$0]  (%p1067_p0), %s1159_s6, 256, %s1157_s26, %s499_s18, %s954_s23, %s954_s23, %s955_s9  }
 0x272 PF: > { %s529_s7 = sand.u32 1, %s925_s15   ;;  %p1234_p4 = scmp.ne.s32.totalorder %s1223_s24, 0 }
 0x273   : > { %p1235_p8 = scmp.ge.s32.totalorder %s945_s20, 2  ;;  %s530_s2 = scalar_lea.sflag [#allocation6], %s529_s7 }
 0x275   : > { %p714_p10 = pnand %p1235_p8, %p1234_p4 }
 0x277   : > { %p715_p5 = pneg %p714_p10 }
 0x279   : > { %920 = dma.done.wait (%p715_p5), %s530_s2, 256  }
 0x27a   : > { %922 = vsyncadd (%p715_p5), %s530_s2, 4294967040  ;;  %s23_s20 = sadd.s32 1, %s945_s20   ;;  %s1236_s18 = sld [smem:[#allocation15_spill]] }
 0x27b   : > { %p20_p7 = scmp.ge.s32.totalorder %s23_s20, 4   ;;  %s1237_s19 = sld [smem:[#allocation16_spill]] }
 0x27c   : > { %s1238_s15 = smov %s929_s16  ;;  %s1239_s16 = smov %s933_s17 }
 0x27d   : > { %s1240_s17 = smov %s1076_s22  ;;  %22 = sbr.rel (!%p20_p7) target bundleno = 10 (0xa), region = 103 }
 0x282   :  { %535 = vsyncpa [#allocation5], 1 }
 0x283   :  { %537 = vsyncpa [#allocation5 + $0x1], 1 }
 0x284   :  { %538 = vsyncpa [#allocation8], 1 }
 0x285   :  { %540 = vsyncpa [#allocation8 + $0x1], 1 }
 0x286   :  { %541 = vsyncpa [#allocation6], 1 }
 0x287   :  { %543 = vsyncpa [#allocation6 + $0x1], 1 }

</bundles_post_ra>
